<compile_context>
chip_gen: v6e
topology: v6e:2x2x1
jax: 0.10.0
libtpu: 0.0.40
codegen_flags: <defaults>
</compile_context>

<pallas_src>
import functools

import jax
import jax.numpy as jnp
from jax.experimental import pallas as pl
from jax.experimental.pallas import tpu as pltpu


def _hyper_edge_kernel(x_ref, m_ref, o_ref, *, compute_dtype):
    # x_ref: [block_n, V*C_in]   one batch chunk (f32 in HBM/VMEM; cast to bf16 here)
    # m_ref: [V*C_in, V*C_out]   fused kron(A^T, W^T), resident across grid steps
    # o_ref: [block_n, V*C_out]  lane-dense output chunk
    x = x_ref[...]
    if compute_dtype is not None and x.dtype != compute_dtype:
        x = x.astype(compute_dtype)          # VPU cast, hidden under the matmul/DMA
    acc = jnp.dot(x, m_ref[...], preferred_element_type=jnp.float32)
    o_ref[...] = acc.astype(o_ref.dtype)


def _pick_block_n(n, requested, target=512):
    """Pick a batch chunk size: ~512 samples (>=0.5 MiB tiles, many grid steps)."""
    if requested is not None:
        assert n % requested == 0, "block_n must divide N"
        assert requested == n or requested % 8 == 0, (
            "block_n must be a multiple of 8 (sublane tiling) unless it equals N")
        return requested
    if n <= target:
        return n
    for b in range(target, 7, -1):           # largest divisor of N <= target, multiple of 8
        if b % 8 == 0 and n % b == 0:
            return b
    # No suitable divisor (e.g. odd N): fall back to a single block.
    # TODO(synk): pad N to a multiple of 8 for pathological batch sizes.
    return n


def hyper_edge_forward(x, joint_label, proj_weight, num_edges, *,
                       block_n=None, compute_dtype=jnp.bfloat16):
    """
    x            : [N, V, C_in] float32   (N = batch * frames)
    joint_label  : [V] int32, values in [0, num_edges)
    proj_weight  : [C_out, C_in] float32  (nn.Linear weight, y = x @ W^T)
    num_edges    : static Python int E
    block_n      : samples per grid step (None -> auto, ~512)
    compute_dtype: MXU input dtype (default bf16; f32 accumulation, f32 output).
                   Pass None for full-f32 compute.
    returns (f_e [N, V, C_out], joint_label, hyper_matrix [V, E])
    """
    N, V, C_in = x.shape
    C_out = proj_weight.shape[0]

    # --- tiny plain-JAX glue: hyper matrix, aggregation matrix, fused operator -------
    hyper_matrix = jax.nn.one_hot(joint_label, num_edges, dtype=jnp.float32)   # [V, E]
    # NOTE: no empty-edge guard -> matches PyTorch (0/0 -> NaN for an empty hyper-edge).
    counts = jnp.sum(hyper_matrix, axis=0, keepdims=True)
    A = hyper_matrix @ (hyper_matrix / counts).T                                # [V, V]

    # f_e[n] = A @ x[n] @ W^T   <=>   f_e_flat = x_flat @ kron(A^T, W^T)
    M = jnp.kron(A.T, proj_weight.T)                                            # [V*C_in, V*C_out]
    M = M.astype(compute_dtype if compute_dtype is not None else x.dtype)

    x_flat = x.reshape(N, V * C_in)          # free: contiguous row-major reshape

    block_n = _pick_block_n(N, block_n)
    n_blocks = N // block_n

    kernel = functools.partial(_hyper_edge_kernel, compute_dtype=compute_dtype)
    out_flat = pl.pallas_call(
        kernel,
        out_shape=jax.ShapeDtypeStruct((N, V * C_out), x.dtype),
        grid=(n_blocks,),
        in_specs=[
            pl.BlockSpec((block_n, V * C_in), lambda i: (i, 0)),      # x chunk (pipelined)
            pl.BlockSpec((V * C_in, V * C_out), lambda i: (0, 0)),    # fused weights, resident
        ],
        out_specs=pl.BlockSpec((block_n, V * C_out), lambda i: (i, 0)),
        compiler_params=pltpu.CompilerParams(
            dimension_semantics=("parallel",)),                        # dual-TC on v7x
    )(x_flat, M)

    f_e = out_flat.reshape(N, V, C_out)      # free reshape
    return f_e, joint_label, hyper_matrix


def _reference_forward(x, joint_label, proj_weight, num_edges):
    # Pure-JAX mirror of the PyTorch forward (for the correctness check).
    label = jax.nn.one_hot(joint_label, num_edges, dtype=jnp.float32)          # [V, E]
    xt = jnp.transpose(x, (0, 2, 1))                                           # [N, C, V]
    z = xt @ (label / jnp.sum(label, axis=0, keepdims=True))                   # [N, C, E]
    z = jnp.transpose(z, (0, 2, 1)) @ proj_weight.T                            # [N, E, C_out]
    f_e = z[:, joint_label, :]                                                 # [N, V, C_out]
    return f_e


if __name__ == "__main__":
    key = jax.random.PRNGKey(0)
    k_x, k_w = jax.random.split(key)

    # Small shapes consistent with the module: N*T = 8, V = num_joint = 17, in_c = out_c = 32.
    N, V, C_in, C_out, E = 8, 17, 32, 32, 5

    # Hard joint_label: 17 joints grouped into 5 hyper-edges (deterministic).
    joint_label = jnp.array(
        [0, 0, 0, 1, 1, 1, 2, 2, 2, 2, 3, 3, 3, 4, 4, 4, 4], dtype=jnp.int32)

    x = jax.random.normal(k_x, (N, V, C_in), dtype=jnp.float32)
    proj_weight = (jax.random.normal(k_w, (C_out, C_in), dtype=jnp.float32)
                   * (1.0 / jnp.sqrt(C_in)))  # deterministic Linear weight, no bias

    fwd = jax.jit(hyper_edge_forward,
                  static_argnums=(3,),
                  static_argnames=("block_n", "compute_dtype"))

    f_e_ref = _reference_forward(x, joint_label, proj_weight, E)

    # Full-f32 compute path: tight check against the PyTorch-mirror reference.
    f_e32, jl, hm = fwd(x, joint_label, proj_weight, E, compute_dtype=None)
    jax.block_until_ready(f_e32)
    assert f_e32.shape == (N, V, C_out)
    assert hm.shape == (V, E)
    assert jnp.allclose(f_e32, f_e_ref, atol=1e-4, rtol=1e-4)

    # Default bf16 compute path (the fast path on v5e/v6e/v7x): loose tolerance.
    f_e_bf, _, _ = fwd(x, joint_label, proj_weight, E, compute_dtype=jnp.bfloat16)
    jax.block_until_ready(f_e_bf)
    assert f_e_bf.shape == (N, V, C_out)
    assert jnp.allclose(f_e_bf, f_e_ref, atol=5e-2, rtol=5e-2)

    print("KERNEL_OK")
</pallas_src>

<mosaic_0001>
module attributes {stable_mosaic.version = 11 : i64} {
  func.func @_hyper_edge_kernel(%arg0: i32, %arg1: memref<8x544xf32, #tpu.memory_space<vmem>>, %arg2: memref<544x544xf32, #tpu.memory_space<vmem>>, %arg3: memref<8x544xf32, #tpu.memory_space<vmem>>) attributes {dimension_semantics = [#tpu.dimension_semantics<parallel>], iteration_bounds = array<i64: 1>, scalar_prefetch = 0 : i64, scratch_operands = 0 : i64, tpu.core_type = #tpu.core_type<tc>, window_params = [{transform_indices = @transform_0, window_bounds = array<i64: 8, 544>}, {pipeline_mode = #tpu.pipeline_mode<synchronous>, transform_indices = @transform_1, window_bounds = array<i64: 544, 544>}, {transform_indices = @transform_2, window_bounds = array<i64: 8, 544>}]} {
    %c0 = arith.constant 0 : index
    %c0_0 = arith.constant 0 : index
    %0 = vector.load %arg1[%c0, %c0_0] : memref<8x544xf32, #tpu.memory_space<vmem>>, vector<8x544xf32>
    %c0_1 = arith.constant 0 : index
    %c0_2 = arith.constant 0 : index
    %1 = vector.load %arg2[%c0_1, %c0_2] : memref<544x544xf32, #tpu.memory_space<vmem>>, vector<544x544xf32>
    %cst = arith.constant dense<0.000000e+00> : vector<8x544xf32>
    %2 = tpu.matmul %0, %1, %cst {dimension_numbers = #tpu.dot_dimension_numbers<[1], [0], [0], [1], [0, 0, 1, 1], [], []>} : vector<8x544xf32>, vector<544x544xf32>, vector<8x544xf32> -> vector<8x544xf32>
    %c0_3 = arith.constant 0 : index
    %c0_4 = arith.constant 0 : index
    %3 = vector.load %arg3[%c0_3, %c0_4] : memref<8x544xf32, #tpu.memory_space<vmem>>, vector<8x544xf32>
    tpu.vector_store %arg3[%c0_3, %c0_4], %2 {strides = array<i32>} : memref<8x544xf32, #tpu.memory_space<vmem>>, vector<8x544xf32>,
    return
  }
  func.func @transform_0(%arg0: i32) -> (i32, i32) {
    %c0_i32 = arith.constant 0 : i32
    %c0_i32_0 = arith.constant 0 : i32
    return %arg0, %c0_i32 : i32, i32
  }
  func.func @transform_1(%arg0: i32) -> (i32, i32) {
    %c0_i32 = arith.constant 0 : i32
    %c0_i32_0 = arith.constant 0 : i32
    %c0_i32_1 = arith.constant 0 : i32
    return %c0_i32, %c0_i32_0 : i32, i32
  }
  func.func @transform_2(%arg0: i32) -> (i32, i32) {
    %c0_i32 = arith.constant 0 : i32
    %c0_i32_0 = arith.constant 0 : i32
    return %arg0, %c0_i32 : i32, i32
  }
}

</mosaic_0001>

<bundles_post_ra>
// kernel: hyper_edge_forward.1
= control target key start
LH: loop header
LB: loop body
LE: loop exit
PB: predicated region body
PF: predicated region fallthrough
CT: control target
= control target key end

     0   :  { %vm356_vm0 = vcmask 261120   ;;  %vm1097_vm1 = vmmov 0   ;;  %s2199_s1 = inlined_call_operand.vmem [shape: f32[544,544], index: 1, kind: input, shape index: {}]   ;;  %s2200_s0 = inlined_call_operand.vmem [shape: f32[8,544], index: 0, kind: input, shape index: {}]   ;;  %s2201_s2 = inlined_call_operand.vmem [shape: f32[8,544], index: 2, kind: output, shape index: {}]  }
   0x1   :  { %v92_v0 = vld [vmem:[%s2199_s1 + $0x260] sm:$0xff]  ;;  %v91_v2 = vld [vmem:[%s2199_s1 + $0x258] sm:$0xff]  ;;  %v86_v6 = vld [vmem:[%s2199_s1 + $0x230] sm:$0xff] }
   0x2   :  { %v252_v1 = vld [vmem:[%s2199_s1 + $0x760] sm:$0xff]  ;;  %360 = vmatprep.subr.mxu0 %v92_v0  ;;  %v251_v3 = vld [vmem:[%s2199_s1 + $0x758] sm:$0xff]  ;;  %v246_v7 = vld [vmem:[%s2199_s1 + $0x730] sm:$0xff] }
   0x3   :  { %431 = vmatprep.subr.mxu1 %v252_v1  ;;  %v87_v4 = vld [vmem:[%s2199_s1 + $0x238] sm:$0xff]  ;;  %361 = vmatpush1.msra.mxu0 %v91_v2  ;;  %v82_v8 = vld [vmem:[%s2199_s1 + $0x210] sm:$0xff]  ;;  %v81_v10 = vld [vmem:[%s2199_s1 + $0x208] sm:$0xff] }
   0x4   :  { %v247_v5 = vld [vmem:[%s2199_s1 + $0x738] sm:$0xff]  ;;  %432 = vmatpush1.msra.mxu1 %v251_v3  ;;  %362 = vmatprep.subr.mxu0 %v87_v4  ;;  %v242_v9 = vld [vmem:[%s2199_s1 + $0x710] sm:$0xff]  ;;  %v241_v11 = vld [vmem:[%s2199_s1 + $0x708] sm:$0xff] }
   0x5   :  { %433 = vmatprep.subr.mxu1 %v247_v5  ;;  %363 = vmatpush1.msra.mxu0 %v86_v6  ;;  %v77_v12 = vld [vmem:[%s2199_s1 + $0x1e8] sm:$0xff]  ;;  %v76_v14 = vld [vmem:[%s2199_s1 + $0x1e0] sm:$0xff]  ;;  %v71_v18 = vld [vmem:[%s2199_s1 + $0x1b8] sm:$0xff] }
   0x6   :  { %434 = vmatpush1.msra.mxu1 %v246_v7  ;;  %v237_v13 = vld [vmem:[%s2199_s1 + $0x6e8] sm:$0xff]  ;;  %364 = vmatprep.subr.mxu0 %v82_v8  ;;  %v236_v15 = vld [vmem:[%s2199_s1 + $0x6e0] sm:$0xff]  ;;  %v231_v19 = vld [vmem:[%s2199_s1 + $0x6b8] sm:$0xff] }
   0x7   :  { %435 = vmatprep.subr.mxu1 %v242_v9  ;;  %365 = vmatpush1.msra.mxu0 %v81_v10  ;;  %v72_v16 = vld [vmem:[%s2199_s1 + $0x1c0] sm:$0xff]  ;;  %v67_v20 = vld [vmem:[%s2199_s1 + $0x198] sm:$0xff]  ;;  %v66_v22 = vld [vmem:[%s2199_s1 + $0x190] sm:$0xff] }
   0x8   :  { %436 = vmatpush1.msra.mxu1 %v241_v11  ;;  %v232_v17 = vld [vmem:[%s2199_s1 + $0x6c0] sm:$0xff]  ;;  %366 = vmatprep.subr.mxu0 %v77_v12  ;;  %v227_v21 = vld [vmem:[%s2199_s1 + $0x698] sm:$0xff]  ;;  %v226_v23 = vld [vmem:[%s2199_s1 + $0x690] sm:$0xff] }
   0x9   :  { %437 = vmatprep.subr.mxu1 %v237_v13  ;;  %367 = vmatpush1.msra.mxu0 %v76_v14  ;;  %v62_v24 = vld [vmem:[%s2199_s1 + $0x170] sm:$0xff]  ;;  %v61_v26 = vld [vmem:[%s2199_s1 + $0x168] sm:$0xff]  ;;  %v56_v30 = vld [vmem:[%s2199_s1 + $0x140] sm:$0xff] }
   0xa   :  { %438 = vmatpush1.msra.mxu1 %v236_v15  ;;  %368 = vmatprep.subr.mxu0 %v72_v16  ;;  %v222_v25 = vld [vmem:[%s2199_s1 + $0x670] sm:$0xff]  ;;  %v221_v27 = vld [vmem:[%s2199_s1 + $0x668] sm:$0xff]  ;;  %v216_v31 = vld [vmem:[%s2199_s1 + $0x640] sm:$0xff] }
   0xb   :  { %439 = vmatprep.subr.mxu1 %v232_v17  ;;  %369 = vmatpush1.msra.mxu0 %v71_v18  ;;  %v57_v28 = vld [vmem:[%s2199_s1 + $0x148] sm:$0xff]  ;;  %v52_v32 = vld [vmem:[%s2199_s1 + $0x120] sm:$0xff]  ;;  %v51_v34 = vld [vmem:[%s2199_s1 + $0x118] sm:$0xff] }
   0xc   :  { %440 = vmatpush1.msra.mxu1 %v231_v19  ;;  %370 = vmatprep.subr.mxu0 %v67_v20  ;;  %v217_v29 = vld [vmem:[%s2199_s1 + $0x648] sm:$0xff]  ;;  %v212_v33 = vld [vmem:[%s2199_s1 + $0x620] sm:$0xff]  ;;  %v211_v35 = vld [vmem:[%s2199_s1 + $0x618] sm:$0xff] }
   0xd   :  { %441 = vmatprep.subr.mxu1 %v227_v21  ;;  %371 = vmatpush1.msra.mxu0 %v66_v22  ;;  %v47_v36 = vld [vmem:[%s2199_s1 + $0xf8] sm:$0xff]  ;;  %v46_v38 = vld [vmem:[%s2199_s1 + $0xf0] sm:$0xff]  ;;  %v41_v42 = vld [vmem:[%s2199_s1 + $0xc8] sm:$0xff] }
   0xe   :  { %442 = vmatpush1.msra.mxu1 %v226_v23  ;;  %372 = vmatprep.subr.mxu0 %v62_v24  ;;  %v207_v37 = vld [vmem:[%s2199_s1 + $0x5f8] sm:$0xff]  ;;  %v206_v39 = vld [vmem:[%s2199_s1 + $0x5f0] sm:$0xff]  ;;  %v201_v43 = vld [vmem:[%s2199_s1 + $0x5c8] sm:$0xff] }
   0xf   :  { %443 = vmatprep.subr.mxu1 %v222_v25  ;;  %373 = vmatpush1.msra.mxu0 %v61_v26  ;;  %v42_v40 = vld [vmem:[%s2199_s1 + $0xd0] sm:$0xff]  ;;  %v37_v44 = vld [vmem:[%s2199_s1 + $0xa8] sm:$0xff]  ;;  %v36_v46 = vld [vmem:[%s2199_s1 + $0xa0] sm:$0xff] }
  0x10   :  { %444 = vmatpush1.msra.mxu1 %v221_v27  ;;  %374 = vmatprep.subr.mxu0 %v57_v28  ;;  %v202_v41 = vld [vmem:[%s2199_s1 + $0x5d0] sm:$0xff]  ;;  %v197_v45 = vld [vmem:[%s2199_s1 + $0x5a8] sm:$0xff]  ;;  %v196_v47 = vld [vmem:[%s2199_s1 + $0x5a0] sm:$0xff] }
  0x11   :  { %445 = vmatprep.subr.mxu1 %v217_v29  ;;  %375 = vmatpush1.msra.mxu0 %v56_v30  ;;  %v32_v48 = vld [vmem:[%s2199_s1 + $0x80] sm:$0xff]  ;;  %v31_v50 = vld [vmem:[%s2199_s1 + $0x78] sm:$0xff]  ;;  %v26_v54 = vld [vmem:[%s2199_s1 + $0x50] sm:$0xff] }
  0x12   :  { %446 = vmatpush1.msra.mxu1 %v216_v31  ;;  %376 = vmatprep.subr.mxu0 %v52_v32  ;;  %v192_v49 = vld [vmem:[%s2199_s1 + $0x580] sm:$0xff]  ;;  %v191_v51 = vld [vmem:[%s2199_s1 + $0x578] sm:$0xff]  ;;  %v186_v55 = vld [vmem:[%s2199_s1 + $0x550] sm:$0xff] }
  0x13   :  { %447 = vmatprep.subr.mxu1 %v212_v33  ;;  %377 = vmatpush1.msra.mxu0 %v51_v34  ;;  %v27_v52 = vld [vmem:[%s2199_s1 + $0x58] sm:$0xff]  ;;  %v22_v56 = vld [vmem:[%s2199_s1 + $0x30] sm:$0xff]  ;;  %v21_v58 = vld [vmem:[%s2199_s1 + $0x28] sm:$0xff] }
  0x14   :  { %448 = vmatpush1.msra.mxu1 %v211_v35  ;;  %378 = vmatprep.subr.mxu0 %v47_v36  ;;  %v187_v53 = vld [vmem:[%s2199_s1 + $0x558] sm:$0xff]  ;;  %v182_v57 = vld [vmem:[%s2199_s1 + $0x530] sm:$0xff]  ;;  %v181_v59 = vld [vmem:[%s2199_s1 + $0x528] sm:$0xff] }
  0x15   :  { %449 = vmatprep.subr.mxu1 %v207_v37  ;;  %379 = vmatpush1.msra.mxu0 %v46_v38  ;;  %v17_v60 = vld [vmem:[%s2199_s1 + $0x8] sm:$0xff]  ;;  %v16_v62 = vld [vmem:[%s2199_s1] sm:$0xff]  ;;  %v171_v2 = vld [vmem:[%s2199_s1 + $0x4d8] sm:$0xff] }
  0x16   :  { %450 = vmatpush1.msra.mxu1 %v206_v39  ;;  %380 = vmatprep.subr.mxu0 %v42_v40  ;;  %v177_v61 = vld [vmem:[%s2199_s1 + $0x508] sm:$0xff]  ;;  %v176_v63 = vld [vmem:[%s2199_s1 + $0x500] sm:$0xff]  ;;  %v331_v3 = vld [vmem:[%s2199_s1 + $0x9d8] sm:$0xff] }
  0x17   :  { %451 = vmatprep.subr.mxu1 %v202_v41  ;;  %381 = vmatpush1.msra.mxu0 %v41_v42  ;;  %v172_v0 = vld [vmem:[%s2199_s1 + $0x4e0] sm:$0xff]  ;;  %v167_v4 = vld [vmem:[%s2199_s1 + $0x4b8] sm:$0xff]  ;;  %v166_v6 = vld [vmem:[%s2199_s1 + $0x4b0] sm:$0xff] }
  0x18   :  { %452 = vmatpush1.msra.mxu1 %v201_v43  ;;  %382 = vmatprep.subr.mxu0 %v37_v44  ;;  %v332_v1 = vld [vmem:[%s2199_s1 + $0x9e0] sm:$0xff]  ;;  %v327_v5 = vld [vmem:[%s2199_s1 + $0x9b8] sm:$0xff]  ;;  %v326_v7 = vld [vmem:[%s2199_s1 + $0x9b0] sm:$0xff] }
  0x19   :  { %453 = vmatprep.subr.mxu1 %v197_v45  ;;  %383 = vmatpush1.msra.mxu0 %v36_v46  ;;  %v162_v8 = vld [vmem:[%s2199_s1 + $0x490] sm:$0xff]  ;;  %v161_v10 = vld [vmem:[%s2199_s1 + $0x488] sm:$0xff]  ;;  %v156_v14 = vld [vmem:[%s2199_s1 + $0x460] sm:$0xff] }
  0x1a   :  { %454 = vmatpush1.msra.mxu1 %v196_v47  ;;  %384 = vmatprep.subr.mxu0 %v32_v48  ;;  %v322_v9 = vld [vmem:[%s2199_s1 + $0x990] sm:$0xff]  ;;  %v321_v11 = vld [vmem:[%s2199_s1 + $0x988] sm:$0xff]  ;;  %v316_v15 = vld [vmem:[%s2199_s1 + $0x960] sm:$0xff] }
  0x1b   :  { %455 = vmatprep.subr.mxu1 %v192_v49  ;;  %385 = vmatpush1.msra.mxu0 %v31_v50  ;;  %v157_v12 = vld [vmem:[%s2199_s1 + $0x468] sm:$0xff]  ;;  %v152_v16 = vld [vmem:[%s2199_s1 + $0x440] sm:$0xff]  ;;  %v151_v18 = vld [vmem:[%s2199_s1 + $0x438] sm:$0xff] }
  0x1c   :  { %456 = vmatpush1.msra.mxu1 %v191_v51  ;;  %386 = vmatprep.subr.mxu0 %v27_v52  ;;  %v317_v13 = vld [vmem:[%s2199_s1 + $0x968] sm:$0xff]  ;;  %v312_v17 = vld [vmem:[%s2199_s1 + $0x940] sm:$0xff]  ;;  %v311_v19 = vld [vmem:[%s2199_s1 + $0x938] sm:$0xff] }
  0x1d   :  { %457 = vmatprep.subr.mxu1 %v187_v53  ;;  %387 = vmatpush1.msra.mxu0 %v26_v54  ;;  %v147_v20 = vld [vmem:[%s2199_s1 + $0x418] sm:$0xff]  ;;  %v146_v22 = vld [vmem:[%s2199_s1 + $0x410] sm:$0xff]  ;;  %v141_v26 = vld [vmem:[%s2199_s1 + $0x3e8] sm:$0xff] }
  0x1e   :  { %458 = vmatpush1.msra.mxu1 %v186_v55  ;;  %388 = vmatprep.subr.mxu0 %v22_v56  ;;  %v307_v21 = vld [vmem:[%s2199_s1 + $0x918] sm:$0xff]  ;;  %v306_v23 = vld [vmem:[%s2199_s1 + $0x910] sm:$0xff]  ;;  %v301_v27 = vld [vmem:[%s2199_s1 + $0x8e8] sm:$0xff] }
  0x1f   :  { %459 = vmatprep.subr.mxu1 %v182_v57  ;;  %389 = vmatpush1.msra.mxu0 %v21_v58  ;;  %v142_v24 = vld [vmem:[%s2199_s1 + $0x3f0] sm:$0xff]  ;;  %v137_v28 = vld [vmem:[%s2199_s1 + $0x3c8] sm:$0xff]  ;;  %v136_v30 = vld [vmem:[%s2199_s1 + $0x3c0] sm:$0xff] }
  0x20   :  { %460 = vmatpush1.msra.mxu1 %v181_v59  ;;  %390 = vmatprep.subr.mxu0 %v17_v60  ;;  %v302_v25 = vld [vmem:[%s2199_s1 + $0x8f0] sm:$0xff]  ;;  %v297_v29 = vld [vmem:[%s2199_s1 + $0x8c8] sm:$0xff]  ;;  %v296_v31 = vld [vmem:[%s2199_s1 + $0x8c0] sm:$0xff] }
  0x21   :  { %461 = vmatprep.subr.mxu1 %v177_v61  ;;  %391 = vmatpush1.msra.mxu0 %v16_v62  ;;  %v132_v32 = vld [vmem:[%s2199_s1 + $0x3a0] sm:$0xff]  ;;  %v131_v34 = vld [vmem:[%s2199_s1 + $0x398] sm:$0xff]  ;;  %v126_v38 = vld [vmem:[%s2199_s1 + $0x370] sm:$0xff] }
  0x22   :  { %462 = vmatpush1.msra.mxu1 %v176_v63  ;;  %392 = vmatprep.subr.mxu0 %v172_v0  ;;  %v292_v33 = vld [vmem:[%s2199_s1 + $0x8a0] sm:$0xff]  ;;  %v291_v35 = vld [vmem:[%s2199_s1 + $0x898] sm:$0xff]  ;;  %v286_v39 = vld [vmem:[%s2199_s1 + $0x870] sm:$0xff] }
  0x23   :  { %463 = vmatprep.subr.mxu1 %v332_v1  ;;  %393 = vmatpush2.msra.mxu0 %v171_v2  ;;  %v127_v36 = vld [vmem:[%s2199_s1 + $0x378] sm:$0xff]  ;;  %v122_v40 = vld [vmem:[%s2199_s1 + $0x350] sm:$0xff]  ;;  %v121_v42 = vld [vmem:[%s2199_s1 + $0x348] sm:$0xff] }
  0x24   :  { %464 = vmatpush2.msra.mxu1 %v331_v3  ;;  %394 = vmatprep.subr.mxu0 %v167_v4  ;;  %v287_v37 = vld [vmem:[%s2199_s1 + $0x878] sm:$0xff]  ;;  %v282_v41 = vld [vmem:[%s2199_s1 + $0x850] sm:$0xff]  ;;  %v281_v43 = vld [vmem:[%s2199_s1 + $0x848] sm:$0xff] }
  0x25   :  { %465 = vmatprep.subr.mxu1 %v327_v5  ;;  %395 = vmatpush2.msra.mxu0 %v166_v6  ;;  %v117_v44 = vld [vmem:[%s2199_s1 + $0x328] sm:$0xff]  ;;  %v116_v46 = vld [vmem:[%s2199_s1 + $0x320] sm:$0xff]  ;;  %v111_v50 = vld [vmem:[%s2199_s1 + $0x2f8] sm:$0xff] }
  0x26   :  { %466 = vmatpush2.msra.mxu1 %v326_v7  ;;  %396 = vmatprep.subr.mxu0 %v162_v8  ;;  %v277_v45 = vld [vmem:[%s2199_s1 + $0x828] sm:$0xff]  ;;  %v276_v47 = vld [vmem:[%s2199_s1 + $0x820] sm:$0xff]  ;;  %v271_v51 = vld [vmem:[%s2199_s1 + $0x7f8] sm:$0xff] }
  0x27   :  { %467 = vmatprep.subr.mxu1 %v322_v9  ;;  %397 = vmatpush2.msra.mxu0 %v161_v10  ;;  %v112_v48 = vld [vmem:[%s2199_s1 + $0x300] sm:$0xff]  ;;  %v107_v52 = vld [vmem:[%s2199_s1 + $0x2d8] sm:$0xff]  ;;  %v106_v54 = vld [vmem:[%s2199_s1 + $0x2d0] sm:$0xff] }
  0x28   :  { %468 = vmatpush2.msra.mxu1 %v321_v11  ;;  %398 = vmatprep.subr.mxu0 %v157_v12  ;;  %v272_v49 = vld [vmem:[%s2199_s1 + $0x800] sm:$0xff]  ;;  %v267_v53 = vld [vmem:[%s2199_s1 + $0x7d8] sm:$0xff]  ;;  %v266_v55 = vld [vmem:[%s2199_s1 + $0x7d0] sm:$0xff] }
  0x29   :  { %469 = vmatprep.subr.mxu1 %v317_v13  ;;  %399 = vmatpush2.msra.mxu0 %v156_v14  ;;  %v102_v56 = vld [vmem:[%s2199_s1 + $0x2b0] sm:$0xff]  ;;  %v101_v58 = vld [vmem:[%s2199_s1 + $0x2a8] sm:$0xff]  ;;  %v96_v62 = vld [vmem:[%s2199_s1 + $0x280] sm:$0xff] }
  0x2a   :  { %470 = vmatpush2.msra.mxu1 %v316_v15  ;;  %400 = vmatprep.subr.mxu0 %v152_v16  ;;  %v262_v57 = vld [vmem:[%s2199_s1 + $0x7b0] sm:$0xff]  ;;  %v261_v59 = vld [vmem:[%s2199_s1 + $0x7a8] sm:$0xff]  ;;  %v256_v0 = vld [vmem:[%s2199_s1 + $0x780] sm:$0xff] }
  0x2b   :  { %471 = vmatprep.subr.mxu1 %v312_v17  ;;  %401 = vmatpush2.msra.mxu0 %v151_v18  ;;  %v97_v60 = vld [vmem:[%s2199_s1 + $0x288] sm:$0xff]  ;;  %v1505_v1 = vld [vmem:[%s2200_s0 + $0x18] sm:$0xff]  ;;  %v1510_v2 = vld [vmem:[%s2200_s0] sm:$0xff] }
  0x2c   :  { %472 = vmatpush2.msra.mxu1 %v311_v19  ;;  %402 = vmatprep.subr.mxu0 %v147_v20  ;;  %v257_v61 = vld [vmem:[%s2199_s1 + $0x788] sm:$0xff]  ;;  %v1515_v3 = vld [vmem:[%s2200_s0 + $0x10] sm:$0xff]  ;;  %v352_v4 = vld [vmem:[%s2199_s1 + $0xa80] sm:$0xff] }
  0x2d   :  { %473 = vmatprep.subr.mxu1 %v307_v21  ;;  %403 = vmatpush2.msra.mxu0 %v146_v22  ;;  %v1497_v63 = vld [vmem:[%s2200_s0 + $0x8] sm:$0xff]  ;;  %v94_v5 = vld [vmem:[%s2199_s1 + $0x270] sm:$0xff]  ;;  %v351_v6 = vld [vmem:[%s2199_s1 + $0xa78] sm:$0xff] }
  0x2e   :  { %474 = vmatpush2.msra.mxu1 %v306_v23  ;;  %404 = vmatprep.subr.mxu0 %v142_v24  ;;  %v93_v7 = vld [vmem:[%s2199_s1 + $0x268] sm:$0xff]  ;;  %v347_v8 = vld [vmem:[%s2199_s1 + $0xa58] sm:$0xff]  ;;  %v346_v10 = vld [vmem:[%s2199_s1 + $0xa50] sm:$0xff]  ;;  %v1096_v23 = vmov 0.0  }
  0x2f   :  { %475 = vmatprep.subr.mxu1 %v302_v25  ;;  %405 = vmatpush2.msra.mxu0 %v141_v26  ;;  %v89_v9 = vld [vmem:[%s2199_s1 + $0x248] sm:$0xff]  ;;  %v88_v11 = vld [vmem:[%s2199_s1 + $0x240] sm:$0xff]  ;;  %v342_v12 = vld [vmem:[%s2199_s1 + $0xa30] sm:$0xff] }
  0x30   :  { %476 = vmatpush2.msra.mxu1 %v301_v27  ;;  %406 = vmatprep.subr.mxu0 %v137_v28  ;;  %v84_v13 = vld [vmem:[%s2199_s1 + $0x220] sm:$0xff]  ;;  %v341_v14 = vld [vmem:[%s2199_s1 + $0xa28] sm:$0xff]  ;;  %v83_v15 = vld [vmem:[%s2199_s1 + $0x218] sm:$0xff] }
  0x31   :  { %477 = vmatprep.subr.mxu1 %v297_v29  ;;  %407 = vmatpush2.msra.mxu0 %v136_v30  ;;  %v337_v16 = vld [vmem:[%s2199_s1 + $0xa08] sm:$0xff]  ;;  %v79_v17 = vld [vmem:[%s2199_s1 + $0x1f8] sm:$0xff]  ;;  %v336_v18 = vld [vmem:[%s2199_s1 + $0xa00] sm:$0xff] }
  0x32   :  { %478 = vmatpush2.msra.mxu1 %v296_v31  ;;  %408 = vmatprep.subr.mxu0 %v132_v32  ;;  %v78_v19 = vld [vmem:[%s2199_s1 + $0x1f0] sm:$0xff]  ;;  %v1572_v20 = vld [vmem:[%s2200_s0 + $0x20] sm:$0xff]  ;;  %v73_v24 = vld [vmem:[%s2199_s1 + $0x1c8] sm:$0xff] }
  0x33   :  { %479 = vmatprep.subr.mxu1 %v292_v33  ;;  %409 = vmatpush2.msra.mxu0 %v131_v34  ;;  %v74_v21 = vld [vmem:[%s2199_s1 + $0x1d0] sm:$0xff]  ;;  %v253_v25 = vld [vmem:[%s2199_s1 + $0x768] sm:$0xff]  ;;  %v68_v28 = vld [vmem:[%s2199_s1 + $0x1a0] sm:$0xff] }
  0x34   :  { %480 = vmatpush2.msra.mxu1 %v291_v35  ;;  %410 = vmatprep.subr.mxu0 %v127_v36  ;;  %v254_v22 = vld [vmem:[%s2199_s1 + $0x770] sm:$0xff]  ;;  %v69_v26 = vld [vmem:[%s2199_s1 + $0x1a8] sm:$0xff]  ;;  %v248_v29 = vld [vmem:[%s2199_s1 + $0x740] sm:$0xff] }
  0x35   :  { %481 = vmatprep.subr.mxu1 %v287_v37  ;;  %411 = vmatpush2.msra.mxu0 %v126_v38  ;;  %v249_v27 = vld [vmem:[%s2199_s1 + $0x748] sm:$0xff]  ;;  %v64_v30 = vld [vmem:[%s2199_s1 + $0x180] sm:$0xff]  ;;  %v63_v32 = vld [vmem:[%s2199_s1 + $0x178] sm:$0xff] }
  0x36   :  { %482 = vmatpush2.msra.mxu1 %v286_v39  ;;  %412 = vmatprep.subr.mxu0 %v122_v40  ;;  %v244_v31 = vld [vmem:[%s2199_s1 + $0x720] sm:$0xff]  ;;  %v243_v33 = vld [vmem:[%s2199_s1 + $0x718] sm:$0xff]  ;;  %v58_v36 = vld [vmem:[%s2199_s1 + $0x150] sm:$0xff] }
  0x37   :  { %483 = vmatprep.subr.mxu1 %v282_v41  ;;  %413 = vmatpush2.msra.mxu0 %v121_v42  ;;  %v59_v34 = vld [vmem:[%s2199_s1 + $0x158] sm:$0xff]  ;;  %v238_v37 = vld [vmem:[%s2199_s1 + $0x6f0] sm:$0xff]  ;;  %v53_v40 = vld [vmem:[%s2199_s1 + $0x128] sm:$0xff] }
  0x38   :  { %484 = vmatpush2.msra.mxu1 %v281_v43  ;;  %414 = vmatprep.subr.mxu0 %v117_v44  ;;  %v239_v35 = vld [vmem:[%s2199_s1 + $0x6f8] sm:$0xff]  ;;  %v54_v38 = vld [vmem:[%s2199_s1 + $0x130] sm:$0xff]  ;;  %v233_v41 = vld [vmem:[%s2199_s1 + $0x6c8] sm:$0xff] }
  0x39   :  { %485 = vmatprep.subr.mxu1 %v277_v45  ;;  %415 = vmatpush2.msra.mxu0 %v116_v46  ;;  %v234_v39 = vld [vmem:[%s2199_s1 + $0x6d0] sm:$0xff]  ;;  %v49_v42 = vld [vmem:[%s2199_s1 + $0x108] sm:$0xff]  ;;  %v48_v44 = vld [vmem:[%s2199_s1 + $0x100] sm:$0xff] }
  0x3a   :  { %486 = vmatpush2.msra.mxu1 %v276_v47  ;;  %416 = vmatprep.subr.mxu0 %v112_v48  ;;  %v229_v43 = vld [vmem:[%s2199_s1 + $0x6a8] sm:$0xff]  ;;  %v228_v45 = vld [vmem:[%s2199_s1 + $0x6a0] sm:$0xff]  ;;  %v43_v48 = vld [vmem:[%s2199_s1 + $0xd8] sm:$0xff] }
  0x3b   :  { %487 = vmatprep.subr.mxu1 %v272_v49  ;;  %417 = vmatpush2.msra.mxu0 %v111_v50  ;;  %v44_v46 = vld [vmem:[%s2199_s1 + $0xe0] sm:$0xff]  ;;  %v223_v49 = vld [vmem:[%s2199_s1 + $0x678] sm:$0xff] }
  0x3c   :  { %488 = vmatpush2.msra.mxu1 %v271_v51  ;;  %418 = vmatprep.subr.mxu0 %v107_v52  ;;  %v224_v47 = vld [vmem:[%s2199_s1 + $0x680] sm:$0xff]  ;;  %v39_v50 = vld [vmem:[%s2199_s1 + $0xb8] sm:$0xff]  ;;  %v38_v52 = vld [vmem:[%s2199_s1 + $0xb0] sm:$0xff] }
  0x3d   :  { %489 = vmatprep.subr.mxu1 %v267_v53  ;;  %419 = vmatpush2.msra.mxu0 %v106_v54  ;;  %v219_v51 = vld [vmem:[%s2199_s1 + $0x658] sm:$0xff]  ;;  %v218_v53 = vld [vmem:[%s2199_s1 + $0x650] sm:$0xff] }
  0x3e   :  { %490 = vmatpush2.msra.mxu1 %v266_v55  ;;  %420 = vmatprep.subr.mxu0 %v102_v56  ;;  %v34_v54 = vld [vmem:[%s2199_s1 + $0x90] sm:$0xff]  ;;  %v33_v56 = vld [vmem:[%s2199_s1 + $0x88] sm:$0xff] }
  0x3f   :  { %491 = vmatprep.subr.mxu1 %v262_v57  ;;  %421 = vmatpush2.msra.mxu0 %v101_v58  ;;  %v214_v55 = vld [vmem:[%s2199_s1 + $0x630] sm:$0xff]  ;;  %v213_v57 = vld [vmem:[%s2199_s1 + $0x628] sm:$0xff] }
  0x40   :  { %492 = vmatpush2.msra.mxu1 %v261_v59  ;;  %422 = vmatprep.subr.mxu0 %v97_v60  ;;  %v29_v58 = vld [vmem:[%s2199_s1 + $0x68] sm:$0xff]  ;;  %v28_v60 = vld [vmem:[%s2199_s1 + $0x60] sm:$0xff] }
  0x41   :  { %493 = vmatprep.subr.mxu1 %v257_v61  ;;  %423 = vmatpush2.msra.mxu0 %v96_v62  ;;  %v209_v59 = vld [vmem:[%s2199_s1 + $0x608] sm:$0xff]  ;;  %v208_v61 = vld [vmem:[%s2199_s1 + $0x600] sm:$0xff] }
  0x42   :  { %424 = vmatprep.mubr.f32.mxu0 %v1497_v63  ;;  %494 = vmatpush2.msra.mxu1 %v256_v0  ;;  %v24_v62 = vld [vmem:[%s2199_s1 + $0x40] sm:$0xff] }
  0x43   :  { %495 = vmatprep.mubr.f32.mxu1 %v1505_v1  ;;  %425 = vmatmul.mubr.f32.vlgmr.msra.gmra.mxu0 %v1510_v2  ;;  %v204_v0 = vld [vmem:[%s2199_s1 + $0x5e0] sm:$0xff] }
  0x44   :  { %496 = vmatmul.mubr.f32.vlgmr.msra.gmra.mxu1 %v1515_v3  ;;  %526 = vmatprep.subr.mxu0 %v352_v4  ;;  %v23_v4 = vld [vmem:[%s2199_s1 + $0x38] sm:$0xff] }
  0x45   :  { %573 = vmatprep.subr.mxu1 %v94_v5  ;;  %527 = vmatpush1.msra.mxu0 %v351_v6  ;;  %v203_v5 = vld [vmem:[%s2199_s1 + $0x5d8] sm:$0xff] }
  0x46   :  { %574 = vmatpush1.msra.mxu1 %v93_v7  ;;  %528 = vmatprep.subr.mxu0 %v347_v8  ;;  %v19_v6 = vld [vmem:[%s2199_s1 + $0x18] sm:$0xff]  ;;  %v18_v8 = vld [vmem:[%s2199_s1 + $0x10] sm:$0xff] }
  0x47   :  { %575 = vmatprep.subr.mxu1 %v89_v9  ;;  %529 = vmatpush1.msra.mxu0 %v346_v10  ;;  %v199_v7 = vld [vmem:[%s2199_s1 + $0x5b8] sm:$0xff]  ;;  %v198_v9 = vld [vmem:[%s2199_s1 + $0x5b0] sm:$0xff] }
  0x48   :  { %576 = vmatpush1.msra.mxu1 %v88_v11  ;;  %530 = vmatprep.subr.mxu0 %v342_v12  ;;  %v174_v10 = vld [vmem:[%s2199_s1 + $0x4f0] sm:$0xff]  ;;  %v173_v12 = vld [vmem:[%s2199_s1 + $0x4e8] sm:$0xff] }
  0x49   :  { %577 = vmatprep.subr.mxu1 %v84_v13  ;;  %531 = vmatpush1.msra.mxu0 %v341_v14  ;;  %v194_v11 = vld [vmem:[%s2199_s1 + $0x590] sm:$0xff]  ;;  %v193_v13 = vld [vmem:[%s2199_s1 + $0x588] sm:$0xff] }
  0x4a   :  { %578 = vmatpush1.msra.mxu1 %v83_v15  ;;  %532 = vmatprep.subr.mxu0 %v337_v16  ;;  %v169_v14 = vld [vmem:[%s2199_s1 + $0x4c8] sm:$0xff]  ;;  %v168_v16 = vld [vmem:[%s2199_s1 + $0x4c0] sm:$0xff] }
  0x4b   :  { %579 = vmatprep.subr.mxu1 %v79_v17  ;;  %533 = vmatpush1.msra.mxu0 %v336_v18  ;;  %v189_v15 = vld [vmem:[%s2199_s1 + $0x568] sm:$0xff]  ;;  %v188_v17 = vld [vmem:[%s2199_s1 + $0x560] sm:$0xff] }
  0x4c   :  { %566 = vmatprep.mubr.f32.mxu0 %v1096_v23  ;;  %580 = vmatpush1.msra.mxu1 %v78_v19  ;;  %v164_v18 = vld [vmem:[%s2199_s1 + $0x4a0] sm:$0xff] }
  0x4d   :  { %1005 = vmatmul.mubr.msk.f32.vlgmr.msra.gmra.mxu0 %vm356_vm0, %v1572_v20  ;;  %581 = vmatprep.subr.mxu1 %v74_v21  ;;  %v184_v19 = vld [vmem:[%s2199_s1 + $0x540] sm:$0xff]  ;;  %v163_v21 = vld [vmem:[%s2199_s1 + $0x498] sm:$0xff] }
  0x4e   :  { %644 = vmatprep.subr.mxu0 %v254_v22  ;;  %582 = vmatpush1.msra.mxu1 %v73_v24  ;;  %v183_v22 = vld [vmem:[%s2199_s1 + $0x538] sm:$0xff] }
  0x4f   :  { %645 = vmatpush1.msra.mxu0 %v253_v25  ;;  %583 = vmatprep.subr.mxu1 %v69_v26  ;;  %v159_v24 = vld [vmem:[%s2199_s1 + $0x478] sm:$0xff]  ;;  %v158_v26 = vld [vmem:[%s2199_s1 + $0x470] sm:$0xff] }
  0x50   :  { %646 = vmatprep.subr.mxu0 %v249_v27  ;;  %584 = vmatpush1.msra.mxu1 %v68_v28  ;;  %v179_v25 = vld [vmem:[%s2199_s1 + $0x518] sm:$0xff]  ;;  %v178_v27 = vld [vmem:[%s2199_s1 + $0x510] sm:$0xff] }
  0x51   :  { %647 = vmatpush1.msra.mxu0 %v248_v29  ;;  %585 = vmatprep.subr.mxu1 %v64_v30  ;;  %v154_v28 = vld [vmem:[%s2199_s1 + $0x450] sm:$0xff]  ;;  %v153_v30 = vld [vmem:[%s2199_s1 + $0x448] sm:$0xff] }
  0x52   :  { %648 = vmatprep.subr.mxu0 %v244_v31  ;;  %586 = vmatpush1.msra.mxu1 %v63_v32  ;;  %v334_v29 = vld [vmem:[%s2199_s1 + $0x9f0] sm:$0xff]  ;;  %v333_v31 = vld [vmem:[%s2199_s1 + $0x9e8] sm:$0xff] }
  0x53   :  { %649 = vmatpush1.msra.mxu0 %v243_v33  ;;  %587 = vmatprep.subr.mxu1 %v59_v34  ;;  %v149_v32 = vld [vmem:[%s2199_s1 + $0x428] sm:$0xff]  ;;  %v148_v34 = vld [vmem:[%s2199_s1 + $0x420] sm:$0xff] }
  0x54   :  { %650 = vmatprep.subr.mxu0 %v239_v35  ;;  %588 = vmatpush1.msra.mxu1 %v58_v36  ;;  %v329_v33 = vld [vmem:[%s2199_s1 + $0x9c8] sm:$0xff]  ;;  %v328_v35 = vld [vmem:[%s2199_s1 + $0x9c0] sm:$0xff] }
  0x55   :  { %651 = vmatpush1.msra.mxu0 %v238_v37  ;;  %589 = vmatprep.subr.mxu1 %v54_v38  ;;  %v144_v36 = vld [vmem:[%s2199_s1 + $0x400] sm:$0xff]  ;;  %v143_v38 = vld [vmem:[%s2199_s1 + $0x3f8] sm:$0xff] }
  0x56   :  { %652 = vmatprep.subr.mxu0 %v234_v39  ;;  %590 = vmatpush1.msra.mxu1 %v53_v40  ;;  %v324_v37 = vld [vmem:[%s2199_s1 + $0x9a0] sm:$0xff]  ;;  %v323_v39 = vld [vmem:[%s2199_s1 + $0x998] sm:$0xff] }
  0x57   :  { %653 = vmatpush1.msra.mxu0 %v233_v41  ;;  %591 = vmatprep.subr.mxu1 %v49_v42  ;;  %v139_v40 = vld [vmem:[%s2199_s1 + $0x3d8] sm:$0xff]  ;;  %v138_v42 = vld [vmem:[%s2199_s1 + $0x3d0] sm:$0xff] }
  0x58   :  { %654 = vmatprep.subr.mxu0 %v229_v43  ;;  %592 = vmatpush1.msra.mxu1 %v48_v44  ;;  %v319_v41 = vld [vmem:[%s2199_s1 + $0x978] sm:$0xff]  ;;  %v318_v43 = vld [vmem:[%s2199_s1 + $0x970] sm:$0xff] }
  0x59   :  { %655 = vmatpush1.msra.mxu0 %v228_v45  ;;  %593 = vmatprep.subr.mxu1 %v44_v46  ;;  %v134_v44 = vld [vmem:[%s2199_s1 + $0x3b0] sm:$0xff]  ;;  %v133_v46 = vld [vmem:[%s2199_s1 + $0x3a8] sm:$0xff] }
  0x5a   :  { %656 = vmatprep.subr.mxu0 %v224_v47  ;;  %594 = vmatpush1.msra.mxu1 %v43_v48  ;;  %v314_v45 = vld [vmem:[%s2199_s1 + $0x950] sm:$0xff]  ;;  %v313_v47 = vld [vmem:[%s2199_s1 + $0x948] sm:$0xff] }
  0x5b   :  { %657 = vmatpush1.msra.mxu0 %v223_v49  ;;  %595 = vmatprep.subr.mxu1 %v39_v50  ;;  %v129_v48 = vld [vmem:[%s2199_s1 + $0x388] sm:$0xff]  ;;  %v128_v50 = vld [vmem:[%s2199_s1 + $0x380] sm:$0xff] }
  0x5c   :  { %658 = vmatprep.subr.mxu0 %v219_v51  ;;  %596 = vmatpush1.msra.mxu1 %v38_v52  ;;  %v309_v49 = vld [vmem:[%s2199_s1 + $0x928] sm:$0xff]  ;;  %v308_v51 = vld [vmem:[%s2199_s1 + $0x920] sm:$0xff] }
  0x5d   :  { %659 = vmatpush1.msra.mxu0 %v218_v53  ;;  %597 = vmatprep.subr.mxu1 %v34_v54  ;;  %v124_v52 = vld [vmem:[%s2199_s1 + $0x360] sm:$0xff]  ;;  %v123_v54 = vld [vmem:[%s2199_s1 + $0x358] sm:$0xff] }
  0x5e   :  { %660 = vmatprep.subr.mxu0 %v214_v55  ;;  %598 = vmatpush1.msra.mxu1 %v33_v56  ;;  %v304_v53 = vld [vmem:[%s2199_s1 + $0x900] sm:$0xff]  ;;  %v303_v55 = vld [vmem:[%s2199_s1 + $0x8f8] sm:$0xff] }
  0x5f   :  { %661 = vmatpush1.msra.mxu0 %v213_v57  ;;  %599 = vmatprep.subr.mxu1 %v29_v58  ;;  %v119_v56 = vld [vmem:[%s2199_s1 + $0x338] sm:$0xff]  ;;  %v118_v58 = vld [vmem:[%s2199_s1 + $0x330] sm:$0xff] }
  0x60   :  { %662 = vmatprep.subr.mxu0 %v209_v59  ;;  %600 = vmatpush1.msra.mxu1 %v28_v60  ;;  %v299_v57 = vld [vmem:[%s2199_s1 + $0x8d8] sm:$0xff]  ;;  %v298_v59 = vld [vmem:[%s2199_s1 + $0x8d0] sm:$0xff] }
  0x61   :  { %663 = vmatpush1.msra.mxu0 %v208_v61  ;;  %601 = vmatprep.subr.mxu1 %v24_v62  ;;  %v114_v60 = vld [vmem:[%s2199_s1 + $0x310] sm:$0xff]  ;;  %v113_v62 = vld [vmem:[%s2199_s1 + $0x308] sm:$0xff] }
  0x62   :  { %664 = vmatprep.subr.mxu0 %v204_v0  ;;  %602 = vmatpush1.msra.mxu1 %v23_v4  ;;  %v294_v61 = vld [vmem:[%s2199_s1 + $0x8b0] sm:$0xff]  ;;  %v293_v0 = vld [vmem:[%s2199_s1 + $0x8a8] sm:$0xff] }
  0x63   :  { %665 = vmatpush1.msra.mxu0 %v203_v5  ;;  %603 = vmatprep.subr.mxu1 %v19_v6  ;;  %v109_v4 = vld [vmem:[%s2199_s1 + $0x2e8] sm:$0xff]  ;;  %v108_v6 = vld [vmem:[%s2199_s1 + $0x2e0] sm:$0xff] }
  0x64   :  { %666 = vmatprep.subr.mxu0 %v199_v7  ;;  %604 = vmatpush1.msra.mxu1 %v18_v8  ;;  %v289_v5 = vld [vmem:[%s2199_s1 + $0x888] sm:$0xff]  ;;  %v288_v7 = vld [vmem:[%s2199_s1 + $0x880] sm:$0xff] }
  0x65   :  { %667 = vmatpush1.msra.mxu0 %v198_v9  ;;  %605 = vmatprep.subr.mxu1 %v174_v10  ;;  %v104_v8 = vld [vmem:[%s2199_s1 + $0x2c0] sm:$0xff]  ;;  %v103_v10 = vld [vmem:[%s2199_s1 + $0x2b8] sm:$0xff] }
  0x66   :  { %668 = vmatprep.subr.mxu0 %v194_v11  ;;  %606 = vmatpush2.msra.mxu1 %v173_v12  ;;  %v284_v9 = vld [vmem:[%s2199_s1 + $0x860] sm:$0xff]  ;;  %v283_v11 = vld [vmem:[%s2199_s1 + $0x858] sm:$0xff] }
  0x67   :  { %669 = vmatpush1.msra.mxu0 %v193_v13  ;;  %607 = vmatprep.subr.mxu1 %v169_v14  ;;  %v99_v12 = vld [vmem:[%s2199_s1 + $0x298] sm:$0xff]  ;;  %v98_v14 = vld [vmem:[%s2199_s1 + $0x290] sm:$0xff] }
  0x68   :  { %670 = vmatprep.subr.mxu0 %v189_v15  ;;  %608 = vmatpush2.msra.mxu1 %v168_v16  ;;  %v279_v13 = vld [vmem:[%s2199_s1 + $0x838] sm:$0xff]  ;;  %v278_v15 = vld [vmem:[%s2199_s1 + $0x830] sm:$0xff] }
  0x69   :  { %671 = vmatpush1.msra.mxu0 %v188_v17  ;;  %609 = vmatprep.subr.mxu1 %v164_v18  ;;  %v274_v16 = vld [vmem:[%s2199_s1 + $0x810] sm:$0xff]  ;;  %v273_v18 = vld [vmem:[%s2199_s1 + $0x808] sm:$0xff] }
  0x6a   :  { %672 = vmatprep.subr.mxu0 %v184_v19  ;;  %610 = vmatpush2.msra.mxu1 %v163_v21  ;;  %v354_v17 = vld [vmem:[%s2199_s1 + $0xa90] sm:$0xff]  ;;  %v353_v19 = vld [vmem:[%s2199_s1 + $0xa88] sm:$0xff] }
  0x6b   :  { %673 = vmatpush1.msra.mxu0 %v183_v22  ;;  %611 = vmatprep.subr.mxu1 %v159_v24  ;;  %v269_v21 = vld [vmem:[%s2199_s1 + $0x7e8] sm:$0xff]  ;;  %v268_v24 = vld [vmem:[%s2199_s1 + $0x7e0] sm:$0xff] }
  0x6c   :  { %674 = vmatprep.subr.mxu0 %v179_v25  ;;  %612 = vmatpush2.msra.mxu1 %v158_v26  ;;  %v349_v22 = vld [vmem:[%s2199_s1 + $0xa68] sm:$0xff]  ;;  %v348_v25 = vld [vmem:[%s2199_s1 + $0xa60] sm:$0xff] }
  0x6d   :  { %675 = vmatpush1.msra.mxu0 %v178_v27  ;;  %613 = vmatprep.subr.mxu1 %v154_v28  ;;  %v264_v26 = vld [vmem:[%s2199_s1 + $0x7c0] sm:$0xff]  ;;  %v263_v28 = vld [vmem:[%s2199_s1 + $0x7b8] sm:$0xff] }
  0x6e   :  { %676 = vmatprep.subr.mxu0 %v334_v29  ;;  %614 = vmatpush2.msra.mxu1 %v153_v30  ;;  %v344_v27 = vld [vmem:[%s2199_s1 + $0xa40] sm:$0xff]  ;;  %v343_v29 = vld [vmem:[%s2199_s1 + $0xa38] sm:$0xff] }
  0x6f   :  { %677 = vmatpush2.msra.mxu0 %v333_v31  ;;  %615 = vmatprep.subr.mxu1 %v149_v32  ;;  %v259_v30 = vld [vmem:[%s2199_s1 + $0x798] sm:$0xff]  ;;  %v258_v32 = vld [vmem:[%s2199_s1 + $0x790] sm:$0xff] }
  0x70   :  { %678 = vmatprep.subr.mxu0 %v329_v33  ;;  %616 = vmatpush2.msra.mxu1 %v148_v34  ;;  %v339_v31 = vld [vmem:[%s2199_s1 + $0xa18] sm:$0xff]  ;;  %v338_v33 = vld [vmem:[%s2199_s1 + $0xa10] sm:$0xff] }
  0x71   :  { %679 = vmatpush2.msra.mxu0 %v328_v35  ;;  %617 = vmatprep.subr.mxu1 %v144_v36  ;;  %v175_v34 = vld [vmem:[%s2199_s1 + $0x4f8] sm:$0xff] }
  0x72   :  { %680 = vmatprep.subr.mxu0 %v324_v37  ;;  %618 = vmatpush2.msra.mxu1 %v143_v38  ;;  %v335_v35 = vld [vmem:[%s2199_s1 + $0x9f8] sm:$0xff]  ;;  %v170_v38 = vld [vmem:[%s2199_s1 + $0x4d0] sm:$0xff] }
  0x73   :  { %681 = vmatpush2.msra.mxu0 %v323_v39  ;;  %619 = vmatprep.subr.mxu1 %v139_v40  ;;  %v95_v36 = vld [vmem:[%s2199_s1 + $0x278] sm:$0xff]  ;;  %v330_v39 = vld [vmem:[%s2199_s1 + $0x9d0] sm:$0xff] }
  0x74   :  { %682 = vmatprep.subr.mxu0 %v319_v41  ;;  %620 = vmatpush2.msra.mxu1 %v138_v42  ;;  %v255_v37 = vld [vmem:[%s2199_s1 + $0x778] sm:$0xff]  ;;  %v90_v40 = vld [vmem:[%s2199_s1 + $0x250] sm:$0xff]  ;;  %v165_v42 = vld [vmem:[%s2199_s1 + $0x4a8] sm:$0xff] }
  0x75   :  { %683 = vmatpush2.msra.mxu0 %v318_v43  ;;  %621 = vmatprep.subr.mxu1 %v134_v44  ;;  %v250_v41 = vld [vmem:[%s2199_s1 + $0x750] sm:$0xff]  ;;  %v325_v43 = vld [vmem:[%s2199_s1 + $0x9a8] sm:$0xff] }
  0x76   :  { %684 = vmatprep.subr.mxu0 %v314_v45  ;;  %622 = vmatpush2.msra.mxu1 %v133_v46  ;;  %v85_v44 = vld [vmem:[%s2199_s1 + $0x228] sm:$0xff]  ;;  %v160_v46 = vld [vmem:[%s2199_s1 + $0x480] sm:$0xff] }
  0x77   :  { %685 = vmatpush2.msra.mxu0 %v313_v47  ;;  %623 = vmatprep.subr.mxu1 %v129_v48  ;;  %v245_v45 = vld [vmem:[%s2199_s1 + $0x728] sm:$0xff]  ;;  %v320_v47 = vld [vmem:[%s2199_s1 + $0x980] sm:$0xff] }
  0x78   :  { %686 = vmatprep.subr.mxu0 %v309_v49  ;;  %624 = vmatpush2.msra.mxu1 %v128_v50  ;;  %v80_v48 = vld [vmem:[%s2199_s1 + $0x200] sm:$0xff]  ;;  %v155_v50 = vld [vmem:[%s2199_s1 + $0x458] sm:$0xff] }
  0x79   :  { %687 = vmatpush2.msra.mxu0 %v308_v51  ;;  %625 = vmatprep.subr.mxu1 %v124_v52  ;;  %v240_v49 = vld [vmem:[%s2199_s1 + $0x700] sm:$0xff]  ;;  %v315_v51 = vld [vmem:[%s2199_s1 + $0x958] sm:$0xff] }
  0x7a   :  { %688 = vmatprep.subr.mxu0 %v304_v53  ;;  %626 = vmatpush2.msra.mxu1 %v123_v54  ;;  %v75_v52 = vld [vmem:[%s2199_s1 + $0x1d8] sm:$0xff]  ;;  %v150_v54 = vld [vmem:[%s2199_s1 + $0x430] sm:$0xff] }
  0x7b   :  { %689 = vmatpush2.msra.mxu0 %v303_v55  ;;  %627 = vmatprep.subr.mxu1 %v119_v56  ;;  %v235_v53 = vld [vmem:[%s2199_s1 + $0x6d8] sm:$0xff]  ;;  %v310_v55 = vld [vmem:[%s2199_s1 + $0x930] sm:$0xff] }
  0x7c   :  { %690 = vmatprep.subr.mxu0 %v299_v57  ;;  %628 = vmatpush2.msra.mxu1 %v118_v58  ;;  %v70_v56 = vld [vmem:[%s2199_s1 + $0x1b0] sm:$0xff]  ;;  %v145_v58 = vld [vmem:[%s2199_s1 + $0x408] sm:$0xff] }
  0x7d   :  { %691 = vmatpush2.msra.mxu0 %v298_v59  ;;  %629 = vmatprep.subr.mxu1 %v114_v60  ;;  %v230_v57 = vld [vmem:[%s2199_s1 + $0x6b0] sm:$0xff]  ;;  %v305_v59 = vld [vmem:[%s2199_s1 + $0x908] sm:$0xff] }
  0x7e   :  { %692 = vmatprep.subr.mxu0 %v294_v61  ;;  %630 = vmatpush2.msra.mxu1 %v113_v62  ;;  %v65_v60 = vld [vmem:[%s2199_s1 + $0x188] sm:$0xff]  ;;  %v140_v62 = vld [vmem:[%s2199_s1 + $0x3e0] sm:$0xff] }
  0x7f   :  { %693 = vmatpush2.msra.mxu0 %v293_v0  ;;  %631 = vmatprep.subr.mxu1 %v109_v4  ;;  %v225_v61 = vld [vmem:[%s2199_s1 + $0x688] sm:$0xff]  ;;  %v300_v0 = vld [vmem:[%s2199_s1 + $0x8e0] sm:$0xff] }
  0x80   :  { %694 = vmatprep.subr.mxu0 %v289_v5  ;;  %632 = vmatpush2.msra.mxu1 %v108_v6  ;;  %v60_v4 = vld [vmem:[%s2199_s1 + $0x160] sm:$0xff]  ;;  %v135_v6 = vld [vmem:[%s2199_s1 + $0x3b8] sm:$0xff] }
  0x81   :  { %695 = vmatpush2.msra.mxu0 %v288_v7  ;;  %633 = vmatprep.subr.mxu1 %v104_v8  ;;  %v220_v5 = vld [vmem:[%s2199_s1 + $0x660] sm:$0xff]  ;;  %v295_v7 = vld [vmem:[%s2199_s1 + $0x8b8] sm:$0xff] }
  0x82   :  { %696 = vmatprep.subr.mxu0 %v284_v9  ;;  %634 = vmatpush2.msra.mxu1 %v103_v10  ;;  %v55_v8 = vld [vmem:[%s2199_s1 + $0x138] sm:$0xff]  ;;  %v130_v10 = vld [vmem:[%s2199_s1 + $0x390] sm:$0xff] }
  0x83   :  { %697 = vmatpush2.msra.mxu0 %v283_v11  ;;  %635 = vmatprep.subr.mxu1 %v99_v12  ;;  %v215_v9 = vld [vmem:[%s2199_s1 + $0x638] sm:$0xff]  ;;  %v290_v11 = vld [vmem:[%s2199_s1 + $0x890] sm:$0xff] }
  0x84   :  { %698 = vmatprep.subr.mxu0 %v279_v13  ;;  %636 = vmatpush2.msra.mxu1 %v98_v14  ;;  %v50_v12 = vld [vmem:[%s2199_s1 + $0x110] sm:$0xff]  ;;  %v125_v14 = vld [vmem:[%s2199_s1 + $0x368] sm:$0xff] }
  0x85   :  { %699 = vmatpush2.msra.mxu0 %v278_v15  ;;  %637 = vmatprep.mubr.f32.mxu1 %v1497_v63  ;;  %v210_v13 = vld [vmem:[%s2199_s1 + $0x610] sm:$0xff]  ;;  %v285_v15 = vld [vmem:[%s2199_s1 + $0x868] sm:$0xff] }
  0x86   :  { %700 = vmatprep.subr.mxu0 %v274_v16  ;;  %739 = vmatprep.subr.mxu1 %v354_v17  ;;  %v45_v16 = vld [vmem:[%s2199_s1 + $0xe8] sm:$0xff] }
  0x87   :  { %638 = vmatmul.mubr.f32.vlgmr.msra.gmra.mxu1 %v1510_v2  ;;  %701 = vmatpush2.msra.mxu0 %v273_v18  ;;  %v205_v17 = vld [vmem:[%s2199_s1 + $0x5e8] sm:$0xff]  ;;  %v120_v18 = vld [vmem:[%s2199_s1 + $0x340] sm:$0xff] }
  0x88   :  { %740 = vmatpush1.msra.mxu1 %v353_v19  ;;  %702 = vmatprep.subr.mxu0 %v269_v21  ;;  %v280_v19 = vld [vmem:[%s2199_s1 + $0x840] sm:$0xff] }
  0x89   :  { %741 = vmatprep.subr.mxu1 %v349_v22  ;;  %703 = vmatpush2.msra.mxu0 %v268_v24  ;;  %v40_v21 = vld [vmem:[%s2199_s1 + $0xc0] sm:$0xff]  ;;  %v115_v24 = vld [vmem:[%s2199_s1 + $0x318] sm:$0xff] }
  0x8a   :  { %742 = vmatpush1.msra.mxu1 %v348_v25  ;;  %704 = vmatprep.subr.mxu0 %v264_v26  ;;  %v200_v22 = vld [vmem:[%s2199_s1 + $0x5c0] sm:$0xff]  ;;  %v275_v25 = vld [vmem:[%s2199_s1 + $0x818] sm:$0xff] }
  0x8b   :  { %743 = vmatprep.subr.mxu1 %v344_v27  ;;  %705 = vmatpush2.msra.mxu0 %v263_v28  ;;  %v35_v26 = vld [vmem:[%s2199_s1 + $0x98] sm:$0xff]  ;;  %v110_v28 = vld [vmem:[%s2199_s1 + $0x2f0] sm:$0xff] }
  0x8c   :  { %744 = vmatpush1.msra.mxu1 %v343_v29  ;;  %706 = vmatprep.subr.mxu0 %v259_v30  ;;  %v195_v27 = vld [vmem:[%s2199_s1 + $0x598] sm:$0xff]  ;;  %v270_v29 = vld [vmem:[%s2199_s1 + $0x7f0] sm:$0xff] }
  0x8d   :  { %745 = vmatprep.subr.mxu1 %v339_v31  ;;  %707 = vmatpush2.msra.mxu0 %v258_v32  ;;  %v30_v30 = vld [vmem:[%s2199_s1 + $0x70] sm:$0xff]  ;;  %v105_v32 = vld [vmem:[%s2199_s1 + $0x2c8] sm:$0xff] }
  0x8e   :  { %708 = vmatprep.mubr.f32.mxu0 %v1505_v1  ;;  %746 = vmatpush1.msra.mxu1 %v338_v33  ;;  %v190_v31 = vld [vmem:[%s2199_s1 + $0x570] sm:$0xff]  ;;  %v265_v33 = vld [vmem:[%s2199_s1 + $0x7c8] sm:$0xff] }
  0x8f   :  { %709 = vmatmul.mubr.f32.vlgmr.msra.gmra.mxu0 %v1515_v3  ;;  %779 = vmatprep.mubr.f32.mxu1 %v1096_v23 }
  0x90   :  { %1008 = vmatprep.subr.mxu0 %v175_v34  ;;  %1043 = vmatprep.subr.mxu1 %v335_v35  ;;  %v25_v34 = vld [vmem:[%s2199_s1 + $0x48] sm:$0xff] }
  0x91   :  { %1006 = vmatmul.mubr.msk.f32.vlgmr.msra.gmra.mxu1 %vm356_vm0, %v1572_v20  ;;  %1009 = vmatpush3.msra.mxu0 %v95_v36  ;;  %v185_v35 = vld [vmem:[%s2199_s1 + $0x548] sm:$0xff]  ;;  %v100_v36 = vld [vmem:[%s2199_s1 + $0x2a0] sm:$0xff] }
  0x92   :  { %1044 = vmatpush3.msra.mxu1 %v255_v37  ;;  %1010 = vmatprep.subr.mxu0 %v170_v38  ;;  %v260_v37 = vld [vmem:[%s2199_s1 + $0x7a0] sm:$0xff] }
  0x93   :  { %1045 = vmatprep.subr.mxu1 %v330_v39  ;;  %1011 = vmatpush3.msra.mxu0 %v90_v40  ;;  %v20_v38 = vld [vmem:[%s2199_s1 + $0x20] sm:$0xff]  ;;  %v355_v40 = vld [vmem:[%s2199_s1 + $0xa98] sm:$0xff] }
  0x94   :  { %1046 = vmatpush3.msra.mxu1 %v250_v41  ;;  %1012 = vmatprep.subr.mxu0 %v165_v42  ;;  %v180_v39 = vld [vmem:[%s2199_s1 + $0x520] sm:$0xff]  ;;  %v350_v41 = vld [vmem:[%s2199_s1 + $0xa70] sm:$0xff] }
  0x95   :  { %1047 = vmatprep.subr.mxu1 %v325_v43  ;;  %1013 = vmatpush3.msra.mxu0 %v85_v44 }
  0x96   :  { %1048 = vmatpush3.msra.mxu1 %v245_v45  ;;  %1014 = vmatprep.subr.mxu0 %v160_v46 }
  0x97   :  { %1049 = vmatprep.subr.mxu1 %v320_v47  ;;  %1015 = vmatpush3.msra.mxu0 %v80_v48 }
  0x98   :  { %1050 = vmatpush3.msra.mxu1 %v240_v49  ;;  %1016 = vmatprep.subr.mxu0 %v155_v50 }
  0x99   :  { %1051 = vmatprep.subr.mxu1 %v315_v51  ;;  %1017 = vmatpush3.msra.mxu0 %v75_v52 }
  0x9a   :  { %1052 = vmatpush3.msra.mxu1 %v235_v53  ;;  %1018 = vmatprep.subr.mxu0 %v150_v54 }
  0x9b   :  { %1053 = vmatprep.subr.mxu1 %v310_v55  ;;  %1019 = vmatpush3.msra.mxu0 %v70_v56 }
  0x9c   :  { %1054 = vmatpush3.msra.mxu1 %v230_v57  ;;  %1020 = vmatprep.subr.mxu0 %v145_v58 }
  0x9d   :  { %1055 = vmatprep.subr.mxu1 %v305_v59  ;;  %1021 = vmatpush3.msra.mxu0 %v65_v60 }
  0x9e   :  { %1056 = vmatpush3.msra.mxu1 %v225_v61  ;;  %1022 = vmatprep.subr.mxu0 %v140_v62 }
  0x9f   :  { %1057 = vmatprep.subr.mxu1 %v300_v0  ;;  %1023 = vmatpush3.msra.mxu0 %v60_v4 }
  0xa0   :  { %1058 = vmatpush3.msra.mxu1 %v220_v5  ;;  %1024 = vmatprep.subr.mxu0 %v135_v6 }
  0xa1   :  { %1059 = vmatprep.subr.mxu1 %v295_v7  ;;  %1025 = vmatpush3.msra.mxu0 %v55_v8 }
  0xa2   :  { %1060 = vmatpush3.msra.mxu1 %v215_v9  ;;  %1026 = vmatprep.subr.mxu0 %v130_v10 }
  0xa3   :  { %1061 = vmatprep.subr.mxu1 %v290_v11  ;;  %1027 = vmatpush3.msra.mxu0 %v50_v12 }
  0xa4   :  { %1062 = vmatpush3.msra.mxu1 %v210_v13  ;;  %1028 = vmatprep.subr.mxu0 %v125_v14 }
  0xa5   :  { %1063 = vmatprep.subr.mxu1 %v285_v15  ;;  %1029 = vmatpush3.msra.mxu0 %v45_v16 }
  0xa6   :  { %1064 = vmatpush3.msra.mxu1 %v205_v17  ;;  %1030 = vmatprep.subr.mxu0 %v120_v18 }
  0xa7   :  { %1065 = vmatprep.subr.mxu1 %v280_v19  ;;  %1031 = vmatpush3.msra.mxu0 %v40_v21 }
  0xa8   :  { %1066 = vmatpush3.msra.mxu1 %v200_v22  ;;  %1032 = vmatprep.subr.mxu0 %v115_v24 }
  0xa9   :  { %1067 = vmatprep.subr.mxu1 %v275_v25  ;;  %1033 = vmatpush3.msra.mxu0 %v35_v26 }
  0xaa   :  { %1068 = vmatpush3.msra.mxu1 %v195_v27  ;;  %1034 = vmatprep.subr.mxu0 %v110_v28 }
  0xab   :  { %1069 = vmatprep.subr.mxu1 %v270_v29  ;;  %1035 = vmatpush3.msra.mxu0 %v30_v30 }
  0xac   :  { %1070 = vmatpush3.msra.mxu1 %v190_v31  ;;  %1036 = vmatprep.subr.mxu0 %v105_v32 }
  0xad   :  { %1071 = vmatprep.subr.mxu1 %v265_v33  ;;  %1037 = vmatpush3.msra.mxu0 %v25_v34 }
  0xae   :  { %1072 = vmatpush3.msra.mxu1 %v185_v35  ;;  %1038 = vmatprep.subr.mxu0 %v100_v36 }
  0xaf   :  { %1073 = vmatprep.subr.mxu1 %v260_v37  ;;  %1039 = vmatpush3.msra.mxu0 %v20_v38 }
  0xb0   :  { %850 = vmatprep.mubr.f32.mxu0 %v1497_v63  ;;  %1074 = vmatpush3.msra.mxu1 %v180_v39  ;;  %v345_v63 = vld [vmem:[%s2199_s1 + $0xa48] sm:$0xff] }
  0xb1   :  { %920 = vmatprep.mubr.f32.mxu1 %v1505_v1  ;;  %851 = vmatmul.mubr.f32.vlgmr.msra.gmra.mxu0 %v1510_v2  ;;  %v340_v1 = vld [vmem:[%s2199_s1 + $0xa20] sm:$0xff] }
  0xb2   :  { %921 = vmatmul.mubr.f32.vlgmr.msra.gmra.mxu1 %v1515_v3  ;;  %1083 = vmatprep.subr.mxu0 %v1096_v23 }
  0xb3   :  { %1091 = vmatprep.mubr.msk.f32.mxu0 %vm1097_vm1, %v1096_v23  ;;  %1084 = vmatpush3.msra.mxu0 %v355_v40 }
  0xb4   :  { %1085 = vmatprep.subr.mxu0 %v1096_v23 }
  0xb5   :  { %1086 = vmatpush3.msra.mxu0 %v350_v41 }
  0xb6   :  { %1087 = vmatprep.subr.mxu0 %v1096_v23 }
  0xb7   :  { %1088 = vmatpush3.msra.mxu0 %v345_v63 }
  0xb8   :  { %1089 = vmatprep.subr.mxu0 %v1096_v23 }
  0xb9   :  { %1090 = vmatpush3.msra.mxu0 %v340_v1 }
  0xba   :  { %1092 = vmatmul.mubr.msk.f32.vlgmr.msra.gmra.mxu0 %vm356_vm0, %v1572_v20 }
 0x103   :  { %v426_v2 = vpop.f32.mrf.mxu0 }
 0x104   :  { %v497_v3 = vpop.f32.mrf.mxu1 }
 0x105   :  { %v428_v42 = vpop.f32.mrf.mxu0  ;;  %v498_v44 = vadd.f32 %v497_v3, %v426_v2 }
 0x106   :  { %v499_v43 = vpop.f32.mrf.mxu1 }
 0x107   :  { %v500_v46 = vadd.f32 %v499_v43, %v428_v42 }
 0x10d   :  { %v568_v45 = vpop.f32.mrf.mxu0 }
 0x10e   :  { %v569_v47 = vadd.f32 %v568_v45, %v498_v44 }
 0x10f   :  { %v570_v48 = vpop.f32.mrf.mxu0 }
 0x110   :  { %996 = vst [vmem:[%s2201_s2] sm:$0xff] %v569_v47  ;;  %v571_v49 = vadd.f32 %v570_v48, %v500_v46 }
 0x112   :  { %997 = vst [vmem:[%s2201_s2 + $0x8] sm:$0xff] %v571_v49 }
 0x147   :  { %v639_v23 = vpop.f32.mrf.mxu1 }
 0x149   :  { %v641_v20 = vpop.f32.mrf.mxu1 }
 0x14f   :  { %v710_v50 = vpop.f32.mrf.mxu0 }
 0x150   :  { %v711_v51 = vadd.f32 %v710_v50, %v639_v23 }
 0x151   :  { %v781_v52 = vpop.f32.mrf.mxu1  ;;  %v712_v53 = vpop.f32.mrf.mxu0 }
 0x152   :  { %v782_v54 = vadd.f32 %v781_v52, %v711_v51  ;;  %v713_v55 = vadd.f32 %v712_v53, %v641_v20 }
 0x153   :  { %v783_v56 = vpop.f32.mrf.mxu1 }
 0x154   :  { %998 = vst [vmem:[%s2201_s2 + $0x10] sm:$0xff] %v782_v54  ;;  %v784_v57 = vadd.f32 %v783_v56, %v713_v55 }
 0x156   :  { %999 = vst [vmem:[%s2201_s2 + $0x18] sm:$0xff] %v784_v57 }
 0x171   :  { %v1040_v58 = vpop.f32.mrf.mxu0 }
 0x172   :  { %v1075_v59 = vpop.f32.mrf.mxu1 }
 0x173   :  { %v1041_v60 = vpop.f32.mrf.mxu0 }
 0x174   :  { %v1076_v61 = vpop.f32.mrf.mxu1  ;;  %v1042_v62 = vadd.f32 %v1041_v60, %v1040_v58 }
 0x175   :  { %v1077_v0 = vadd.f32 %v1076_v61, %v1075_v59 }
 0x177   :  { %v923_v4 = vadd.f32 %v1077_v0, %v1042_v62 }
 0x17a   :  { %v992_v5 = vpop.f32.mrf.mxu0 }
 0x17b   :  { %v993_v6 = vadd.f32 %v992_v5, %v923_v4 }
 0x17c   :  { %v1093_v7 = vpop.f32.mrf.mxu0 }
 0x17d   :  { %1000 = vst.msk [vmem:[%s2201_s2 + $0x20] sm:$0xff] %vm356_vm0, %v993_v6 }

</bundles_post_ra>
